<compile_context>
chip_gen: v5e
topology: v5e:2x2
jax: 0.10.0
libtpu: 0.0.40
codegen_flags: <defaults>
</compile_context>

<pallas_src>
import functools

import jax
import jax.numpy as jnp
from jax import lax
from jax.experimental import pallas as pl
from jax.experimental.pallas import tpu as pltpu

_STATS_LANES = 128


def _vmem_capacity_bytes():
    try:
        return int(pltpu.get_tpu_info().vmem_capacity_bytes)
    except Exception:
        return 64 * 1024 * 1024  # conservative default (v7x per-TC VMEM)


# --------------------------- single-pass kernel ------------------------------

def _setnorm_block_kernel(x_ref, gamma_ref, beta_ref, o_ref, *, epsilon, inv_count):
    """Whole (TB, ...) batch slabs VMEM-resident; stats + apply in one sweep."""
    xr = x_ref[...]
    red = tuple(range(1, xr.ndim))
    # f32 stats straight off the native-dtype tile; the only full-width f32
    # temporary kept live is the centered values `d` (re-used for the apply).
    mu = jnp.sum(xr, axis=red, keepdims=True, dtype=jnp.float32) * inv_count
    d = xr.astype(jnp.float32) - mu
    var = jnp.sum(d * d, axis=red, keepdims=True) * inv_count   # two-pass variance
    inv = lax.rsqrt(var + epsilon)                              # EUP rsqrt
    # Broadcasted multiply-add; no materialized full-width scale/shift arrays.
    o_ref[...] = ((d * inv) * gamma_ref[...] + beta_ref[...]).astype(o_ref.dtype)


# ----------------------- two-pass N-tiled fallback ---------------------------

def _setnorm_stats_kernel(x_ref, s_ref):
    """Fallback pass 1: accumulate per-batch sum / sum-of-squares over N tiles."""
    k = pl.program_id(1)

    @pl.when(k == 0)
    def _init():
        s_ref[...] = jnp.zeros_like(s_ref)

    x = x_ref[...].astype(jnp.float32)            # (1, TNr, D)
    s1 = jnp.sum(x)
    s2 = jnp.sum(x * x)
    s_ref[...] = s_ref[...] + jnp.stack(
        [jnp.full((_STATS_LANES,), s1, jnp.float32),
         jnp.full((_STATS_LANES,), s2, jnp.float32)],
    )[None, :, :]


def _setnorm_apply_kernel(mv_ref, x_ref, gamma_ref, beta_ref, o_ref):
    """Fallback pass 2: re-stream N tiles and apply normalization + affine."""
    b = pl.program_id(0)
    mu = mv_ref[b, 0]                              # SMEM scalars
    inv = mv_ref[b, 1]
    xr = x_ref[...].astype(jnp.float32)            # (1, TNr, D)
    o_ref[...] = ((xr - mu) * inv * gamma_ref[...] + beta_ref[...]).astype(o_ref.dtype)


# ------------------------------- planning ------------------------------------

def _sublane(itemsize):
    return max(8, 32 // itemsize)


def _single_pass_vmem(tb, slab_elems, itemsize):
    block_native = tb * slab_elems * itemsize
    block_f32 = tb * slab_elems * 4
    # double-buffered in + out blocks (native dtype) + ~2 full-width f32 temps.
    return 4 * block_native + 2 * block_f32


def _plan_single_pass(batch, slab_elems, itemsize, cap, allow_any_tb):
    """Batch slabs per grid step; None if one slab can't stay VMEM resident."""
    budget = max(16 << 20, int(cap * 0.6))        # bigger blocks on 128 MiB parts
    max_block = 16 << 20                          # mem-bound sweet spot
    sub = _sublane(itemsize)
    cands = []
    for tb in range(1, batch + 1):
        if batch % tb:
            continue
        if not allow_any_tb and tb != batch and tb % sub != 0:
            continue  # keep the flat-layout block sublane-aligned
        if (_single_pass_vmem(tb, slab_elems, itemsize) <= budget
                and tb * slab_elems * itemsize <= max_block):
            cands.append(tb)
    if not cands:
        return None
    multi = [t for t in cands if batch // t >= 2]  # keep both v7x TCs busy
    return max(multi) if multi else max(cands)


def _plan_row_tile(n_rows, d, itemsize, cap):
    """Fallback: rows of one (N, D) slab per tile (multiple of 8, or == N)."""
    budget = max(16 << 20, int(cap * 0.5))

    def needed(tnr):
        return 4 * tnr * d * itemsize + 2 * tnr * d * 4

    cands = [t for t in range(1, n_rows + 1)
             if n_rows % t == 0 and (t % 8 == 0 or t == n_rows)]
    fitting = [t for t in cands if needed(t) <= budget]
    if fitting:
        return max(fitting)
    # TODO(synk): pathological N/D where no sublane-aligned row tile fits the
    # budget; use the smallest aligned divisor and let Mosaic spill if it must.
    return min(cands)


# -------------------------------- wrapper -------------------------------------

def set_norm(x, gamma, beta, *, epsilon=1e-5, force_row_tile=None):
    """x: (B, N, D); gamma/beta: (D,). Returns (B, N, D) in x.dtype."""
    B, N, D = x.shape
    ND = N * D
    inv_count = 1.0 / float(ND)
    itemsize = x.dtype.itemsize
    cap = _vmem_capacity_bytes()

    gamma_f = gamma.reshape(-1).astype(jnp.float32)
    beta_f = beta.reshape(-1).astype(jnp.float32)

    feature_layout = (D % 128 == 0)   # (..., D) already lane-dense

    tb = None
    if force_row_tile is None:
        tb = _plan_single_pass(B, ND, itemsize, cap, allow_any_tb=feature_layout)

    kernel = functools.partial(
        _setnorm_block_kernel, epsilon=float(epsilon), inv_count=inv_count)

    if tb is not None:
        need = _single_pass_vmem(tb, ND, itemsize)
        vmem_limit = int(min(cap - (4 << 20), max(need + (8 << 20), 32 << 20)))
        cparams = pltpu.CompilerParams(
            dimension_semantics=("parallel",), vmem_limit_bytes=vmem_limit)
        # NOTE: gamma/beta keep default double-buffering; pl.Buffered(1) would
        # only save a few KiB here and is left off for lowering safety.
        if feature_layout:
            return pl.pallas_call(
                kernel,
                out_shape=jax.ShapeDtypeStruct((B, N, D), x.dtype),
                grid_spec=pltpu.PrefetchScalarGridSpec(
                    num_scalar_prefetch=0,
                    grid=(B // tb,),
                    in_specs=[
                        pl.BlockSpec((tb, N, D), lambda b: (b, 0, 0)),
                        pl.BlockSpec((1, 1, D), lambda b: (0, 0, 0)),
                        pl.BlockSpec((1, 1, D), lambda b: (0, 0, 0)),
                    ],
                    out_specs=pl.BlockSpec((tb, N, D), lambda b: (b, 0, 0)),
                ),
                compiler_params=cparams,
            )(x, gamma_f.reshape(1, 1, D), beta_f.reshape(1, 1, D))

        # D not lane-aligned (< 128 or not a multiple of 128): flatten each slab
        # to one lane-dense row; tile the per-feature params once (only here).
        x_flat = x.reshape(B, ND)
        gamma_t = jnp.tile(gamma_f, (N,)).reshape(1, ND)
        beta_t = jnp.tile(beta_f, (N,)).reshape(1, ND)
        out_flat = pl.pallas_call(
            kernel,
            out_shape=jax.ShapeDtypeStruct((B, ND), x.dtype),
            grid_spec=pltpu.PrefetchScalarGridSpec(
                num_scalar_prefetch=0,
                grid=(B // tb,),
                in_specs=[
                    pl.BlockSpec((tb, ND), lambda b: (b, 0)),
                    pl.BlockSpec((1, ND), lambda b: (0, 0)),
                    pl.BlockSpec((1, ND), lambda b: (0, 0)),
                ],
                out_specs=pl.BlockSpec((tb, ND), lambda b: (b, 0)),
            ),
            compiler_params=cparams,
        )(x_flat, gamma_t, beta_t)
        return out_flat.reshape(B, N, D)

    # ------- fallback: one slab can't stay VMEM-resident (v7x 64 MiB) -------
    tnr = force_row_tile if force_row_tile is not None else _plan_row_tile(
        N, D, itemsize, cap)
    assert N % tnr == 0, "row tile must divide N"
    kn = N // tnr
    need = 4 * tnr * D * itemsize + 2 * tnr * D * 4
    vmem_limit = int(min(cap - (4 << 20), max(need + (8 << 20), 32 << 20)))

    stats = pl.pallas_call(
        _setnorm_stats_kernel,
        out_shape=jax.ShapeDtypeStruct((B, 2, _STATS_LANES), jnp.float32),
        grid_spec=pltpu.PrefetchScalarGridSpec(
            num_scalar_prefetch=0,
            grid=(B, kn),
            in_specs=[pl.BlockSpec((1, tnr, D), lambda b, k: (b, k, 0))],
            out_specs=pl.BlockSpec((1, 2, _STATS_LANES), lambda b, k: (b, 0, 0)),
        ),
        compiler_params=pltpu.CompilerParams(
            dimension_semantics=("parallel", "arbitrary"),
            vmem_limit_bytes=vmem_limit),
    )(x)

    s1 = stats[:, 0, 0]
    s2 = stats[:, 1, 0]
    mu = s1 * inv_count
    var = jnp.maximum(s2 * inv_count - mu * mu, 0.0)
    inv = lax.rsqrt(var + float(epsilon))
    mv = jnp.stack([mu, inv], axis=1).astype(jnp.float32)   # (B, 2) -> SMEM

    return pl.pallas_call(
        _setnorm_apply_kernel,
        out_shape=jax.ShapeDtypeStruct((B, N, D), x.dtype),
        grid_spec=pltpu.PrefetchScalarGridSpec(
            num_scalar_prefetch=0,
            grid=(B, kn),
            in_specs=[
                pl.BlockSpec(memory_space=pltpu.MemorySpace.SMEM),   # mv (B, 2)
                pl.BlockSpec((1, tnr, D), lambda b, k: (b, k, 0)),
                pl.BlockSpec((1, 1, D), lambda b, k: (0, 0, 0)),
                pl.BlockSpec((1, 1, D), lambda b, k: (0, 0, 0)),
            ],
            out_specs=pl.BlockSpec((1, tnr, D), lambda b, k: (b, k, 0)),
        ),
        compiler_params=pltpu.CompilerParams(
            dimension_semantics=("parallel", "parallel"),
            vmem_limit_bytes=vmem_limit),
    )(mv, x, gamma_f.reshape(1, 1, D), beta_f.reshape(1, 1, D))


# ------------------------------- reference ------------------------------------

def set_norm_ref(x, gamma, beta, *, epsilon=1e-5):
    xf = x.astype(jnp.float32)
    mu = jnp.mean(xf, axis=(1, 2), keepdims=True)
    sigma = jnp.sqrt(jnp.mean((xf - mu) ** 2, axis=(1, 2), keepdims=True) + epsilon)
    a = (xf - mu) / sigma
    return (a * gamma.reshape(1, 1, -1).astype(jnp.float32)
            + beta.reshape(1, 1, -1).astype(jnp.float32)).astype(x.dtype)


def _check(x, gamma, beta, *, atol, rtol, **kw):
    out = jax.block_until_ready(set_norm(x, gamma, beta, **kw))
    ref = set_norm_ref(x, gamma, beta)
    assert out.shape == x.shape and out.dtype == x.dtype
    assert jnp.allclose(out.astype(jnp.float32), ref.astype(jnp.float32),
                        atol=atol, rtol=rtol), "mismatch vs reference"


if __name__ == "__main__":
    key = jax.random.PRNGKey(0)
    k1, k2, k3, k4 = jax.random.split(key, 4)

    # 1) D < 128 -> lane-dense flat layout (batch=2, set size=8, hidden=32).
    B, N, D = 2, 8, 32
    x = jax.random.normal(k1, (B, N, D), dtype=jnp.float32)
    _check(x, jnp.ones((D,), jnp.float32), jnp.zeros((D,), jnp.float32),
           atol=1e-4, rtol=1e-4)
    g = jax.random.normal(k2, (D,), dtype=jnp.float32)
    b = jax.random.normal(k3, (D,), dtype=jnp.float32)
    _check(x, g, b, atol=1e-4, rtol=1e-4)

    # 2) D % 128 == 0 -> (B, N, D) feature layout, untiled params.
    B2, N2, D2 = 4, 16, 128
    x2 = jax.random.normal(k4, (B2, N2, D2), dtype=jnp.float32)
    g2 = jax.random.normal(k2, (D2,), dtype=jnp.float32)
    b2 = jax.random.normal(k3, (D2,), dtype=jnp.float32)
    _check(x2, g2, b2, atol=1e-4, rtol=1e-4)

    # 3) bf16 input on the feature-layout path.
    _check(x2.astype(jnp.bfloat16), g2, b2, atol=5e-2, rtol=5e-2)

    # 4) Force the two-pass N-tiled fallback (exercises stats + apply kernels).
    _check(x2[:2], g2, b2, atol=1e-3, rtol=1e-3, force_row_tile=8)

    print("KERNEL_OK")
</pallas_src>

<mosaic_0001>
module attributes {stable_mosaic.version = 11 : i64} {
  func.func @_setnorm_block_kernel(%arg0: i32, %arg1: memref<2x256xf32, #tpu.memory_space<vmem>>, %arg2: memref<1x256xf32, #tpu.memory_space<vmem>>, %arg3: memref<1x256xf32, #tpu.memory_space<vmem>>, %arg4: memref<2x256xf32, #tpu.memory_space<vmem>>) attributes {dimension_semantics = [#tpu.dimension_semantics<parallel>], iteration_bounds = array<i64: 1>, scalar_prefetch = 0 : i64, scratch_operands = 0 : i64, tpu.core_type = #tpu.core_type<tc>, window_params = [{transform_indices = @transform_0, window_bounds = array<i64: 2, 256>}, {pipeline_mode = #tpu.pipeline_mode<synchronous>, transform_indices = @transform_1, window_bounds = array<i64: 1, 256>}, {pipeline_mode = #tpu.pipeline_mode<synchronous>, transform_indices = @transform_2, window_bounds = array<i64: 1, 256>}, {transform_indices = @transform_3, window_bounds = array<i64: 2, 256>}]} {
    %c0 = arith.constant 0 : index
    %c0_0 = arith.constant 0 : index
    %0 = vector.load %arg1[%c0, %c0_0] : memref<2x256xf32, #tpu.memory_space<vmem>>, vector<2x256xf32>
    %cst = arith.constant dense<0.000000e+00> : vector<2xf32>
    %1 = vector.multi_reduction <add>, %0, %cst [1] : vector<2x256xf32> to vector<2xf32>
    %2 = vector.shape_cast %1 : vector<2xf32> to vector<2x1xf32>
    %cst_1 = arith.constant 3.906250e-03 : f32
    %3 = vector.broadcast %cst_1 : f32 to vector<2x1xf32>
    %4 = arith.mulf %2, %3 : vector<2x1xf32>
    %5 = vector.broadcast %4 : vector<2x1xf32> to vector<2x256xf32>
    %6 = arith.subf %0, %5 : vector<2x256xf32>
    %7 = arith.mulf %6, %6 : vector<2x256xf32>
    %cst_2 = arith.constant dense<0.000000e+00> : vector<2xf32>
    %8 = vector.multi_reduction <add>, %7, %cst_2 [1] : vector<2x256xf32> to vector<2xf32>
    %9 = vector.shape_cast %8 : vector<2xf32> to vector<2x1xf32>
    %cst_3 = arith.constant 3.906250e-03 : f32
    %10 = vector.broadcast %cst_3 : f32 to vector<2x1xf32>
    %11 = arith.mulf %9, %10 : vector<2x1xf32>
    %cst_4 = arith.constant 9.99999974E-6 : f32
    %12 = vector.broadcast %cst_4 : f32 to vector<2x1xf32>
    %13 = arith.addf %11, %12 : vector<2x1xf32>
    %14 = math.rsqrt %13 : vector<2x1xf32>
    %15 = vector.broadcast %14 : vector<2x1xf32> to vector<2x256xf32>
    %16 = arith.mulf %6, %15 : vector<2x256xf32>
    %c0_5 = arith.constant 0 : index
    %c0_6 = arith.constant 0 : index
    %17 = vector.load %arg2[%c0_5, %c0_6] : memref<1x256xf32, #tpu.memory_space<vmem>>, vector<1x256xf32>
    %18 = vector.broadcast %17 : vector<1x256xf32> to vector<2x256xf32>
    %19 = arith.mulf %16, %18 : vector<2x256xf32>
    %c0_7 = arith.constant 0 : index
    %c0_8 = arith.constant 0 : index
    %20 = vector.load %arg3[%c0_7, %c0_8] : memref<1x256xf32, #tpu.memory_space<vmem>>, vector<1x256xf32>
    %21 = vector.broadcast %20 : vector<1x256xf32> to vector<2x256xf32>
    %22 = arith.addf %19, %21 : vector<2x256xf32>
    %c0_9 = arith.constant 0 : index
    %c0_10 = arith.constant 0 : index
    %23 = vector.load %arg4[%c0_9, %c0_10] : memref<2x256xf32, #tpu.memory_space<vmem>>, vector<2x256xf32>
    tpu.vector_store %arg4[%c0_9, %c0_10], %22 {strides = array<i32>} : memref<2x256xf32, #tpu.memory_space<vmem>>, vector<2x256xf32>,
    return
  }
  func.func @transform_0(%arg0: i32) -> (i32, i32) {
    %c0_i32 = arith.constant 0 : i32
    %c0_i32_0 = arith.constant 0 : i32
    return %arg0, %c0_i32 : i32, i32
  }
  func.func @transform_1(%arg0: i32) -> (i32, i32) {
    %c0_i32 = arith.constant 0 : i32
    %c0_i32_0 = arith.constant 0 : i32
    %c0_i32_1 = arith.constant 0 : i32
    return %c0_i32, %c0_i32_0 : i32, i32
  }
  func.func @transform_2(%arg0: i32) -> (i32, i32) {
    %c0_i32 = arith.constant 0 : i32
    %c0_i32_0 = arith.constant 0 : i32
    %c0_i32_1 = arith.constant 0 : i32
    return %c0_i32, %c0_i32_0 : i32, i32
  }
  func.func @transform_3(%arg0: i32) -> (i32, i32) {
    %c0_i32 = arith.constant 0 : i32
    %c0_i32_0 = arith.constant 0 : i32
    return %arg0, %c0_i32 : i32, i32
  }
}

</mosaic_0001>

<bundles_post_ra>
// kernel: tpu_custom_call.1
= control target key start
LH: loop header
LB: loop body
LE: loop exit
PB: predicated region body
PF: predicated region fallthrough
CT: control target
= control target key end

     0   :  { %8 = vsyncpa [#allocation3], 0  ;;  %s295_s0 = inlined_call_operand.hbm [shape: f32[2,256], index: 0, kind: input, shape index: {}]   ;;  %s296_s1 = inlined_call_operand.hbm [shape: f32[1,256], index: 1, kind: input, shape index: {}]   ;;  %s297_s2 = inlined_call_operand.hbm [shape: f32[1,256], index: 2, kind: input, shape index: {}]   ;;  %s298_s3 = inlined_call_operand.hbm [shape: f32[2,256], index: 3, kind: output, shape index: {}]  }
   0x1   :  { %9 = vsyncpa [#allocation6], 0  ;;  %s27_s14 = sshll.u32 %s296_s1, 4  ;;  %s28_s14 = int_to_ptr.hbm [resolvable:$true] %s27_s14 }
   0x2   :  { %10 = vsyncpa [#allocation4], 0  ;;  %s252_s15 = smov [#allocation5]   ;;  %s16_s19 = sshll.u32 %s295_s0, 4  ;;  %s17_s19 = int_to_ptr.hbm [resolvable:$true] %s16_s19 }
   0x3   :  { %s29_s16 = sshll.u32 %s252_s15, 4  ;;  %s253_s20 = smov [#allocation2]   ;;  %s30_s16 = int_to_ptr.vmem [resolvable:$true] %s29_s16 }
   0x4   :  { %32 = dma.hbm_to_vmem [thread:$0]  %s28_s14, 32, %s30_s16, [#allocation6]  }
   0x5   :  { %s18_s21 = sshll.u32 %s253_s20, 4  ;;  %s38_s24 = sshll.u32 %s297_s2, 4  ;;  %s19_s21 = int_to_ptr.vmem [resolvable:$true] %s18_s21  ;;  %s39_s24 = int_to_ptr.hbm [resolvable:$true] %s38_s24 }
   0x6   :  { %21 = dma.hbm_to_vmem [thread:$0]  %s17_s19, 64, %s19_s21, [#allocation3]  }
   0x7   :  { %s254_s1 = smov [#allocation7]  }
   0x8   :  { %s40_s25 = sshll.u32 %s254_s1, 4  ;;  %s41_s25 = int_to_ptr.vmem [resolvable:$true] %s40_s25 }
   0x9   :  { %43 = dma.hbm_to_vmem [thread:$0]  %s39_s24, 32, %s41_s25, [#allocation6]  }
   0xa   :  { %246 = dma.done.wait [#allocation3], 64  }
   0xb   :  { %247 = vsyncadd [#allocation3], 4294967232 }
   0xc   :  { %248 = dma.done.wait [#allocation6], 64  }
   0xd   :  { %249 = vsyncadd [#allocation6], 4294967232  ;;  %v56_v0 = vld [vmem:[#allocation2] sm:$0xf]  ;;  %vm63_vm0 = vcmask 1041408   ;;  %s256_s0 = smov [#allocation8]  }
   0xe   :  { %58 = vst [vmem:[#allocation1] ss:$4 sm:$0xff] %v56_v0  ;;  %v255_v6 = vmov 269488144   ;;  %v108_v24 = vld [vmem:[#allocation5] sm:$0x3] }
   0xf   :  { %v72_v7 = vunpack.c.l.s4 %v255_v6  ;;  %v116_v26 = vld [vmem:[#allocation7] sm:$0x3]  ;;  %v111_v28 = vperm.slane %v108_v24, 1  ;;  %v110_v32 = vperm.slane %v108_v24, 0  ;;  %s130_s2 = sshll.u32 %s256_s0, 4  ;;  %s132_s28 = sshll.u32 %s298_s3, 4  ;;  %s131_s2 = int_to_ptr.vmem [resolvable:$true] %s130_s2  ;;  %s133_s28 = int_to_ptr.hbm [resolvable:$true] %s132_s28 }
  0x10   :  { %v119_v30 = vperm.slane %v116_v26, 1  ;;  %v118_v35 = vperm.slane %v116_v26, 0 }
  0x11   :  { %v73_v8 = vunpack.c.0.s8 %v72_v7  ;;  %v112_v33 = vrot.slane %v111_v28, 6 }
  0x12   :  { %v120_v36 = vrot.slane %v119_v30, 6 }
  0x13   :  { %v113_v38 = vsel %vm63_vm0, %v110_v32, %v112_v33 }
  0x14   :  { %v121_v40 = vsel %vm63_vm0, %v118_v35, %v120_v36 }
  0x15   :  { %v59_v1 = vld.sshfl [vmem:[#allocation1] sm:$0xff pattern:$0x73625140]  ;;  %v60_v2 = vld.sshfl [vmem:[#allocation1 + $0x8] sm:$0xff pattern:$0x73625140] }
  0x16   :  { %v64_v3 = vsel %vm63_vm0, %v59_v1, 0.0  ;;  %v65_v4 = vsel %vm63_vm0, %v60_v2, 0.0 }
  0x17   :  { %v66_v5 = vadd.f32 %v65_v4, %v64_v3 }
  0x19   :  { %67 = vadd.xlane.f32.xlu0 %v66_v5 }
  0x8c   :  { %v68_v9 = vpop.xlane.xlu0 %67 }
  0x8d   :  { %v69_v10 = vmul.f32 0.00390625, %v68_v9 }
  0x8f   :  { %v74_v11 = vperm.slane %v69_v10, %v73_v8 }
  0x91   :  { %v76_v12 = vsub.f32 %v56_v0, %v74_v11 }
  0x93   :  { %v77_v13 = vmul.f32 %v76_v12, %v76_v12 }
  0x95   :  { %79 = vst [vmem:[#allocation1] ss:$4 sm:$0xff] %v77_v13 }
  0x9c   :  { %v80_v14 = vld.sshfl [vmem:[#allocation1] sm:$0xff pattern:$0x73625140]  ;;  %v81_v15 = vld.sshfl [vmem:[#allocation1 + $0x8] sm:$0xff pattern:$0x73625140] }
  0x9d   :  { %v84_v16 = vsel %vm63_vm0, %v80_v14, 0.0  ;;  %v85_v17 = vsel %vm63_vm0, %v81_v15, 0.0 }
  0x9e   :  { %v86_v18 = vadd.f32 %v85_v17, %v84_v16 }
  0xa0   :  { %87 = vadd.xlane.f32.xlu0 %v86_v18 }
 0x113   :  { %v88_v19 = vpop.xlane.xlu0 %87 }
 0x114   :  { %v89_v20 = vmul.f32 0.00390625, %v88_v19 }
 0x116   :  { %v90_v21 = vadd.f32 1e-05, %v89_v20 }
 0x118   :  { %148 = vrsqrt.f32 %v90_v21  ;;  %vm97_vm2 = vweird.f32 %v90_v21 }
 0x11e   :  { %v149_v22 = vpop.eup %148 }
 0x11f   :  { %v92_v23 = vmul.f32 %v149_v22, %v90_v21  ;;  %vm98_vm1 = vweird.f32 %v149_v22 }
 0x120   :  { %vm99_vm3 = vmor %vm97_vm2, %vm98_vm1 }
 0x121   :  { %v93_v25 = vmul.f32 %v149_v22, %v92_v23 }
 0x123   :  { %v94_v27 = vmul.f32 0.5, %v93_v25 }
 0x125   :  { %v95_v29 = vsub.f32 1.5, %v94_v27 }
 0x127   :  { %v96_v31 = vmul.f32 %v149_v22, %v95_v29 }
 0x129   :  { %v100_v34 = vsel %vm99_vm3, %v149_v22, %v96_v31 }
 0x12a   :  { %v105_v37 = vperm.slane %v100_v34, %v73_v8 }
 0x12c   :  { %v107_v39 = vmul.f32 %v105_v37, %v76_v12 }
 0x12e   :  { %v115_v41 = vmul.f32 %v113_v38, %v107_v39 }
 0x130   :  { %v123_v42 = vadd.f32 %v121_v40, %v115_v41 }
 0x132   :  { %124 = vst [vmem:[#allocation8] sm:$0xf] %v123_v42 }
 0x133   :  { %135 = dma.vmem_to_hbm [thread:$0]  %s131_s2, 64, %s133_s28, [#allocation4]  }
 0x134   :  { %250 = dma.done.wait [#allocation4], 64  }
 0x135   :  { %251 = vsyncadd [#allocation4], 4294967232 }
 0x136   :  { %140 = vsyncpa [#allocation3], 1 }
 0x137   :  { %141 = vsyncpa [#allocation6], 1 }
 0x138   :  { %142 = vsyncpa [#allocation4], 1 }

</bundles_post_ra>
